<compile_context>
chip_gen: v7x
topology: tpu7x:2x2x1
jax: 0.10.0
libtpu: 0.0.40
codegen_flags: <defaults>
</compile_context>

<pallas_src>
import jax
import jax.numpy as jnp
from jax.experimental import pallas as pl
from jax.experimental.pallas import tpu as pltpu

_LANES = 128
_SUBLANES = 8


def _copy4_kernel(a_ref, b_ref, c_ref, d_ref, oa_ref, ob_ref, oc_ref, od_ref):
    # One fused identity copy: four full-block VMEM copies in a single launch.
    oa_ref[...] = a_ref[...]
    ob_ref[...] = b_ref[...]
    oc_ref[...] = c_ref[...]
    od_ref[...] = d_ref[...]


def _to_lane_dense(x: jax.Array) -> jax.Array:
    """Flatten to a lane-dense (rows, 128) 2D slab (zero-pad if needed)."""
    n = x.size
    pad = (-n) % (_SUBLANES * _LANES)
    flat = x.reshape(-1)
    if pad:
        flat = jnp.pad(flat, (0, pad))
    return flat.reshape(-1, _LANES)


def scale_pyramid_forward(conv2_2, conv3_3, conv4_3, conv5_3):
    """Identity passthrough of the 4 feature maps via one fused Pallas kernel."""
    xs = (conv2_2, conv3_3, conv4_3, conv5_3)
    dense = tuple(_to_lane_dense(x) for x in xs)

    out_shape = tuple(jax.ShapeDtypeStruct(d.shape, d.dtype) for d in dense)
    in_specs = [pl.BlockSpec(d.shape, lambda i: (0, 0)) for d in dense]
    out_specs = tuple(pl.BlockSpec(d.shape, lambda i: (0, 0)) for d in dense)

    outs = pl.pallas_call(
        _copy4_kernel,
        out_shape=out_shape,
        grid=(1,),
        in_specs=in_specs,
        out_specs=out_specs,
        compiler_params=pltpu.CompilerParams(
            dimension_semantics=("arbitrary",)
        ),
    )(*dense)

    results = []
    for o, x in zip(outs, xs):
        results.append(o.reshape(-1)[: x.size].reshape(x.shape))
    return tuple(results)


class ScalePyramidModule:
    """JAX/Pallas equivalent of the PyTorch ScalePyramidModule (no parameters)."""

    def __init__(self):
        pass  # module has no parameters

    def __call__(self, conv2_2, conv3_3, conv4_3, conv5_3):
        return scale_pyramid_forward(conv2_2, conv3_3, conv4_3, conv5_3)


if __name__ == "__main__":
    key = jax.random.PRNGKey(0)
    k1, k2, k3, k4 = jax.random.split(key, 4)

    # Small shapes consistent with a VGG-style feature pyramid (NCHW):
    conv2_2 = jax.random.normal(k1, (2, 4, 16, 16), dtype=jnp.float32)
    conv3_3 = jax.random.normal(k2, (2, 8, 8, 8), dtype=jnp.float32)
    conv4_3 = jax.random.normal(k3, (2, 16, 4, 4), dtype=jnp.float32)
    conv5_3 = jax.random.normal(k4, (2, 16, 2, 2), dtype=jnp.float32)

    module = ScalePyramidModule()
    outs = jax.block_until_ready(module(conv2_2, conv3_3, conv4_3, conv5_3))

    # Verify exact passthrough semantics (shapes, dtypes, values).
    refs = (conv2_2, conv3_3, conv4_3, conv5_3)
    for o, r in zip(outs, refs):
        assert o.shape == r.shape and o.dtype == r.dtype
        assert bool(jnp.all(o == r))

    print("KERNEL_OK")
</pallas_src>

<mosaic_0001>
module attributes {stable_mosaic.version = 11 : i64} {
  func.func @_copy4_kernel(%arg0: i32, %arg1: memref<16x128xf32, #tpu.memory_space<vmem>>, %arg2: memref<8x128xf32, #tpu.memory_space<vmem>>, %arg3: memref<8x128xf32, #tpu.memory_space<vmem>>, %arg4: memref<8x128xf32, #tpu.memory_space<vmem>>, %arg5: memref<16x128xf32, #tpu.memory_space<vmem>>, %arg6: memref<8x128xf32, #tpu.memory_space<vmem>>, %arg7: memref<8x128xf32, #tpu.memory_space<vmem>>, %arg8: memref<8x128xf32, #tpu.memory_space<vmem>>) attributes {dimension_semantics = [#tpu.dimension_semantics<arbitrary>], iteration_bounds = array<i64: 1>, scalar_prefetch = 0 : i64, scratch_operands = 0 : i64, tpu.core_type = #tpu.core_type<tc>, window_params = [{pipeline_mode = #tpu.pipeline_mode<synchronous>, transform_indices = @transform_0, window_bounds = array<i64: 16, 128>}, {pipeline_mode = #tpu.pipeline_mode<synchronous>, transform_indices = @transform_1, window_bounds = array<i64: 8, 128>}, {pipeline_mode = #tpu.pipeline_mode<synchronous>, transform_indices = @transform_2, window_bounds = array<i64: 8, 128>}, {pipeline_mode = #tpu.pipeline_mode<synchronous>, transform_indices = @transform_3, window_bounds = array<i64: 8, 128>}, {pipeline_mode = #tpu.pipeline_mode<synchronous>, transform_indices = @transform_4, window_bounds = array<i64: 16, 128>}, {pipeline_mode = #tpu.pipeline_mode<synchronous>, transform_indices = @transform_5, window_bounds = array<i64: 8, 128>}, {pipeline_mode = #tpu.pipeline_mode<synchronous>, transform_indices = @transform_6, window_bounds = array<i64: 8, 128>}, {pipeline_mode = #tpu.pipeline_mode<synchronous>, transform_indices = @transform_7, window_bounds = array<i64: 8, 128>}]} {
    %c0 = arith.constant 0 : index
    %c0_0 = arith.constant 0 : index
    %0 = vector.load %arg1[%c0, %c0_0] : memref<16x128xf32, #tpu.memory_space<vmem>>, vector<16x128xf32>
    %c0_1 = arith.constant 0 : index
    %c0_2 = arith.constant 0 : index
    %1 = vector.load %arg5[%c0_1, %c0_2] : memref<16x128xf32, #tpu.memory_space<vmem>>, vector<16x128xf32>
    tpu.vector_store %arg5[%c0_1, %c0_2], %0 {strides = array<i32>} : memref<16x128xf32, #tpu.memory_space<vmem>>, vector<16x128xf32>,
    %c0_3 = arith.constant 0 : index
    %c0_4 = arith.constant 0 : index
    %2 = vector.load %arg2[%c0_3, %c0_4] : memref<8x128xf32, #tpu.memory_space<vmem>>, vector<8x128xf32>
    %c0_5 = arith.constant 0 : index
    %c0_6 = arith.constant 0 : index
    %3 = vector.load %arg6[%c0_5, %c0_6] : memref<8x128xf32, #tpu.memory_space<vmem>>, vector<8x128xf32>
    tpu.vector_store %arg6[%c0_5, %c0_6], %2 {strides = array<i32>} : memref<8x128xf32, #tpu.memory_space<vmem>>, vector<8x128xf32>,
    %c0_7 = arith.constant 0 : index
    %c0_8 = arith.constant 0 : index
    %4 = vector.load %arg3[%c0_7, %c0_8] : memref<8x128xf32, #tpu.memory_space<vmem>>, vector<8x128xf32>
    %c0_9 = arith.constant 0 : index
    %c0_10 = arith.constant 0 : index
    %5 = vector.load %arg7[%c0_9, %c0_10] : memref<8x128xf32, #tpu.memory_space<vmem>>, vector<8x128xf32>
    tpu.vector_store %arg7[%c0_9, %c0_10], %4 {strides = array<i32>} : memref<8x128xf32, #tpu.memory_space<vmem>>, vector<8x128xf32>,
    %c0_11 = arith.constant 0 : index
    %c0_12 = arith.constant 0 : index
    %6 = vector.load %arg4[%c0_11, %c0_12] : memref<8x128xf32, #tpu.memory_space<vmem>>, vector<8x128xf32>
    %c0_13 = arith.constant 0 : index
    %c0_14 = arith.constant 0 : index
    %7 = vector.load %arg8[%c0_13, %c0_14] : memref<8x128xf32, #tpu.memory_space<vmem>>, vector<8x128xf32>
    tpu.vector_store %arg8[%c0_13, %c0_14], %6 {strides = array<i32>} : memref<8x128xf32, #tpu.memory_space<vmem>>, vector<8x128xf32>,
    return
  }
  func.func @transform_0(%arg0: i32) -> (i32, i32) {
    %c0_i32 = arith.constant 0 : i32
    %c0_i32_0 = arith.constant 0 : i32
    %c0_i32_1 = arith.constant 0 : i32
    return %c0_i32, %c0_i32_0 : i32, i32
  }
  func.func @transform_1(%arg0: i32) -> (i32, i32) {
    %c0_i32 = arith.constant 0 : i32
    %c0_i32_0 = arith.constant 0 : i32
    %c0_i32_1 = arith.constant 0 : i32
    return %c0_i32, %c0_i32_0 : i32, i32
  }
  func.func @transform_2(%arg0: i32) -> (i32, i32) {
    %c0_i32 = arith.constant 0 : i32
    %c0_i32_0 = arith.constant 0 : i32
    %c0_i32_1 = arith.constant 0 : i32
    return %c0_i32, %c0_i32_0 : i32, i32
  }
  func.func @transform_3(%arg0: i32) -> (i32, i32) {
    %c0_i32 = arith.constant 0 : i32
    %c0_i32_0 = arith.constant 0 : i32
    %c0_i32_1 = arith.constant 0 : i32
    return %c0_i32, %c0_i32_0 : i32, i32
  }
  func.func @transform_4(%arg0: i32) -> (i32, i32) {
    %c0_i32 = arith.constant 0 : i32
    %c0_i32_0 = arith.constant 0 : i32
    %c0_i32_1 = arith.constant 0 : i32
    return %c0_i32, %c0_i32_0 : i32, i32
  }
  func.func @transform_5(%arg0: i32) -> (i32, i32) {
    %c0_i32 = arith.constant 0 : i32
    %c0_i32_0 = arith.constant 0 : i32
    %c0_i32_1 = arith.constant 0 : i32
    return %c0_i32, %c0_i32_0 : i32, i32
  }
  func.func @transform_6(%arg0: i32) -> (i32, i32) {
    %c0_i32 = arith.constant 0 : i32
    %c0_i32_0 = arith.constant 0 : i32
    %c0_i32_1 = arith.constant 0 : i32
    return %c0_i32, %c0_i32_0 : i32, i32
  }
  func.func @transform_7(%arg0: i32) -> (i32, i32) {
    %c0_i32 = arith.constant 0 : i32
    %c0_i32_0 = arith.constant 0 : i32
    %c0_i32_1 = arith.constant 0 : i32
    return %c0_i32, %c0_i32_0 : i32, i32
  }
}

</mosaic_0001>

<bundles_post_ra>
// kernel: tpu_custom_call.1
= control target key start
LH: loop header
LB: loop body
LE: loop exit
PB: predicated region body
PF: predicated region fallthrough
CT: control target
= control target key end

     0   :  { %13 = vsyncpa [#allocation3], 0  ;;  %s473_s0 = inlined_call_operand.hbm [shape: f32[16,128], index: 0, kind: input, shape index: {}]   ;;  %s474_s1 = inlined_call_operand.hbm [shape: f32[8,128], index: 1, kind: input, shape index: {}]   ;;  %s475_s2 = inlined_call_operand.hbm [shape: f32[8,128], index: 2, kind: input, shape index: {}]   ;;  %s476_s3 = inlined_call_operand.vmem [shape: f32[8,128], index: 3, kind: input, shape index: {}]   ;;  %s477_s4 = inlined_call_operand.hbm [shape: f32[16,128], index: 4, kind: output, shape index: {0}]   ;;  %s478_s5 = inlined_call_operand.hbm [shape: f32[8,128], index: 5, kind: output, shape index: {1}]   ;;  %s479_s6 = inlined_call_operand.hbm [shape: f32[8,128], index: 6, kind: output, shape index: {2}]   ;;  %s480_s7 = inlined_call_operand.hbm [shape: f32[8,128], index: 7, kind: output, shape index: {3}]  }
   0x1   :  { %14 = vsyncpa [#allocation6], 0 }
   0x2   :  { %15 = vsyncpa [#allocation4], 0 }
   0x3   :  { %16 = vsyncpa [#allocation10], 0 }
   0x4   :  { %17 = vsyncpa [#allocation13], 0  ;;  %s303_s24 = smov [#allocation5]   ;;  %s304_s26 = smov [#allocation2]  }
   0x5   :  { %s36_s25 = sshll.u32 %s303_s24, 4  ;;  %s23_s27 = sshll.u32 %s304_s26, 4  ;;  %s37_s25 = int_to_ptr.vmem [resolvable:$true] %s36_s25  ;;  %s352_s27 = int_to_ptr.vmem [resolvable:$true] %s23_s27 }
   0x6   :  { %s139_s30 = scalar_lea.hbm %s474_s1, 128 }
   0x7   :  { %p140_p0 = scmp.ne.s32.totalorder %s474_s1, %s139_s30  ;;  %p143_p1 = scmp.lt.u32.totalorder %s139_s30, %s474_s1 }
   0x9   :  { %p145_p2 = pnand %p143_p1, %p140_p0 }
   0xb   :  { %148 = shalt.err (!%p145_p2)
}
   0xc   :  { %s149_s12 = scalar_lea.vmem %s37_s25, 128  ;;  %p154_p4 = scmp.lt.s32.totalorder %s37_s25, %s37_s25 }
   0xd   :  { %p150_p3 = scmp.ne.s32.totalorder %s37_s25, %s149_s12  ;;  %p155_p5 = scmp.lt.s32.totalorder %s149_s12, %s149_s12 }
   0xf   :  { %p156_p6 = por %p155_p5, %p154_p4 }
  0x11   :  { %p157_p7 = pnand %p156_p6, %p150_p3 }
  0x13   :  { %160 = shalt.err (!%p157_p7)
}
  0x14   :  { %39 = dma.hbm_to_vmem [thread:$0]  %s474_s1, 128, %s37_s25, [#allocation6]  }
  0x15   :  { %s161_s17 = scalar_lea.hbm %s473_s0, 256 }
  0x16   :  { %p162_p8 = scmp.ne.s32.totalorder %s473_s0, %s161_s17  ;;  %p165_p9 = scmp.lt.u32.totalorder %s161_s17, %s473_s0 }
  0x18   :  { %p167_p10 = pnand %p165_p9, %p162_p8 }
  0x1a   :  { %170 = shalt.err (!%p167_p10)
}
  0x1b   :  { %s171_s22 = scalar_lea.vmem %s352_s27, 256  ;;  %p176_p12 = scmp.lt.s32.totalorder %s352_s27, %s352_s27 }
  0x1c   :  { %p172_p11 = scmp.ne.s32.totalorder %s352_s27, %s171_s22  ;;  %p177_p13 = scmp.lt.s32.totalorder %s171_s22, %s171_s22 }
  0x1e   :  { %p178_p0 = por %p177_p13, %p176_p12 }
  0x20   :  { %p179_p1 = pnand %p178_p0, %p172_p11 }
  0x22   :  { %182 = shalt.err (!%p179_p1)
}
  0x23   :  { %s305_s1 = smov 128   ;;  %s306_s23 = smov 8  }
  0x24   :  { %29 = dma.hbm_to_vmem [thread:$0]  %s473_s0, 256, %s352_s27, [#allocation3], %s305_s1, %s305_s1, %s306_s23  }
  0x25   :  { %s307_s26 = smov [#allocation7]   ;;  %s183_s8 = scalar_lea.hbm %s475_s2, 128 }
  0x26   :  { %s46_s28 = sshll.u32 %s307_s26, 4  ;;  %p184_p2 = scmp.ne.s32.totalorder %s475_s2, %s183_s8  ;;  %s47_s28 = int_to_ptr.vmem [resolvable:$true] %s46_s28 }
  0x27   :  { %p187_p3 = scmp.lt.u32.totalorder %s183_s8, %s475_s2 }
  0x29   :  { %p189_p4 = pnand %p187_p3, %p184_p2 }
  0x2b   :  { %192 = shalt.err (!%p189_p4)
}
  0x2c   :  { %s193_s13 = scalar_lea.vmem %s47_s28, 128  ;;  %p198_p6 = scmp.lt.s32.totalorder %s47_s28, %s47_s28 }
  0x2d   :  { %p194_p5 = scmp.ne.s32.totalorder %s47_s28, %s193_s13  ;;  %p199_p7 = scmp.lt.s32.totalorder %s193_s13, %s193_s13 }
  0x2f   :  { %p200_p8 = por %p199_p7, %p198_p6 }
  0x31   :  { %p201_p9 = pnand %p200_p8, %p194_p5 }
  0x33   :  { %204 = shalt.err (!%p201_p9)
}
  0x34   :  { %49 = dma.hbm_to_vmem [thread:$0]  %s475_s2, 128, %s47_s28, [#allocation6]  }
  0x35   :  { %293 = dma.done.wait [#allocation3], 256  }
  0x36   :  { %294 = vsyncadd [#allocation3], 4294967040 }
  0x37   :  { %295 = dma.done.wait [#allocation6], 256  }
  0x38   :  { %296 = vsyncadd [#allocation6], 4294967040  ;;  %s308_s14 = smov [#allocation9]   ;;  %s309_s16 = smov [#allocation8]   ;;  %v65_v0 = vld [vmem:[#allocation5] sm:$0xff]  ;;  %v61_v1 = vld [vmem:[#allocation2] sm:$0xff] }
  0x39   :  { %s89_s15 = sshll.u32 %s308_s14, 4  ;;  %s76_s17 = sshll.u32 %s309_s16, 4  ;;  %v62_v2 = vld [vmem:[#allocation2 + $0x8] sm:$0xff]  ;;  %66 = vst [vmem:[#allocation9] sm:$0xff] %v65_v0  ;;  %63 = vst [vmem:[#allocation8] sm:$0xff] %v61_v1  ;;  %v67_v3 = vld [vmem:[#allocation7] sm:$0xff]  ;;  %s90_s15 = int_to_ptr.vmem [resolvable:$true] %s89_s15  ;;  %s398_s17 = int_to_ptr.vmem [resolvable:$true] %s76_s17 }
  0x3a   :  { %s310_s18 = smov [#allocation11]   ;;  %s311_s20 = smov [#allocation12]   ;;  %64 = vst [vmem:[#allocation8 + $0x8] sm:$0xff] %v62_v2  ;;  %v69_v4 = vld [vmem:[%s476_s3] sm:$0xff]  ;;  %68 = vst [vmem:[#allocation11] sm:$0xff] %v67_v3 }
  0x3b   :  { %s99_s19 = sshll.u32 %s310_s18, 4  ;;  %s109_s21 = sshll.u32 %s311_s20, 4  ;;  %70 = vst [vmem:[#allocation12] sm:$0xff] %v69_v4  ;;  %s403_s19 = int_to_ptr.vmem [resolvable:$true] %s99_s19  ;;  %s405_s21 = int_to_ptr.vmem [resolvable:$true] %s109_s21 }
  0x3c   :  { %s205_s24 = scalar_lea.vmem %s90_s15, 128  ;;  %p210_p11 = scmp.lt.s32.totalorder %s90_s15, %s90_s15 }
  0x3d   :  { %p206_p10 = scmp.ne.s32.totalorder %s90_s15, %s205_s24  ;;  %p211_p12 = scmp.lt.s32.totalorder %s205_s24, %s205_s24 }
  0x3f   :  { %p212_p13 = por %p211_p12, %p210_p11 }
  0x41   :  { %p213_p0 = pnand %p212_p13, %p206_p10 }
  0x43   :  { %216 = shalt.err (!%p213_p0)
}
  0x44   :  { %s217_s28 = scalar_lea.hbm %s478_s5, 128 }
  0x45   :  { %p218_p1 = scmp.ne.s32.totalorder %s478_s5, %s217_s28  ;;  %p221_p2 = scmp.lt.u32.totalorder %s217_s28, %s478_s5 }
  0x47   :  { %p223_p3 = pnand %p221_p2, %p218_p1 }
  0x49   :  { %226 = shalt.err (!%p223_p3)
}
  0x4a   :  { %92 = dma.vmem_to_hbm [thread:$0]  %s90_s15, 128, %s478_s5, [#allocation10]  }
  0x4b   :  { %s227_s11 = scalar_lea.vmem %s398_s17, 256  ;;  %p232_p5 = scmp.lt.s32.totalorder %s398_s17, %s398_s17 }
  0x4c   :  { %p228_p4 = scmp.ne.s32.totalorder %s398_s17, %s227_s11  ;;  %p233_p6 = scmp.lt.s32.totalorder %s227_s11, %s227_s11 }
  0x4e   :  { %p234_p7 = por %p233_p6, %p232_p5 }
  0x50   :  { %p235_p8 = pnand %p234_p7, %p228_p4 }
  0x52   :  { %238 = shalt.err (!%p235_p8)
}
  0x53   :  { %s239_s0 = scalar_lea.hbm %s477_s4, 256 }
  0x54   :  { %p240_p9 = scmp.ne.s32.totalorder %s477_s4, %s239_s0  ;;  %p243_p10 = scmp.lt.u32.totalorder %s239_s0, %s477_s4 }
  0x56   :  { %p245_p11 = pnand %p243_p10, %p240_p9 }
  0x58   :  { %248 = shalt.err (!%p245_p11)
}
  0x59   :  { %82 = dma.vmem_to_hbm [thread:$0]  %s398_s17, 256, %s477_s4, [#allocation4], %s305_s1, %s305_s1, %s306_s23  }
  0x5a   :  { %s249_s20 = scalar_lea.vmem %s403_s19, 128  ;;  %p254_p13 = scmp.lt.s32.totalorder %s403_s19, %s403_s19 }
  0x5b   :  { %p250_p12 = scmp.ne.s32.totalorder %s403_s19, %s249_s20  ;;  %p255_p0 = scmp.lt.s32.totalorder %s249_s20, %s249_s20 }
  0x5d   :  { %p256_p1 = por %p255_p0, %p254_p13 }
  0x5f   :  { %p257_p2 = pnand %p256_p1, %p250_p12 }
  0x61   :  { %260 = shalt.err (!%p257_p2)
}
  0x62   :  { %s261_s24 = scalar_lea.hbm %s479_s6, 128 }
  0x63   :  { %p262_p3 = scmp.ne.s32.totalorder %s479_s6, %s261_s24  ;;  %p265_p4 = scmp.lt.u32.totalorder %s261_s24, %s479_s6 }
  0x65   :  { %p267_p5 = pnand %p265_p4, %p262_p3 }
  0x67   :  { %270 = shalt.err (!%p267_p5)
}
  0x68   :  { %102 = dma.vmem_to_hbm [thread:$0]  %s403_s19, 128, %s479_s6, [#allocation10]  }
  0x69   :  { %s271_s23 = scalar_lea.vmem %s405_s21, 128  ;;  %p276_p7 = scmp.lt.s32.totalorder %s405_s21, %s405_s21 }
  0x6a   :  { %p272_p6 = scmp.ne.s32.totalorder %s405_s21, %s271_s23  ;;  %p277_p8 = scmp.lt.s32.totalorder %s271_s23, %s271_s23 }
  0x6c   :  { %p278_p9 = por %p277_p8, %p276_p7 }
  0x6e   :  { %p279_p10 = pnand %p278_p9, %p272_p6 }
  0x70   :  { %282 = shalt.err (!%p279_p10)
}
  0x71   :  { %s283_s3 = scalar_lea.hbm %s480_s7, 128 }
  0x72   :  { %p284_p11 = scmp.ne.s32.totalorder %s480_s7, %s283_s3  ;;  %p287_p12 = scmp.lt.u32.totalorder %s283_s3, %s480_s7 }
  0x74   :  { %p289_p13 = pnand %p287_p12, %p284_p11 }
  0x76   :  { %292 = shalt.err (!%p289_p13)
}
  0x77   :  { %112 = dma.vmem_to_hbm [thread:$0]  %s405_s21, 128, %s480_s7, [#allocation13]  }
  0x78   :  { %297 = dma.done.wait [#allocation4], 256  }
  0x79   :  { %298 = vsyncadd [#allocation4], 4294967040 }
  0x7a   :  { %299 = dma.done.wait [#allocation10], 256  }
  0x7b   :  { %300 = vsyncadd [#allocation10], 4294967040 }
  0x7c   :  { %301 = dma.done.wait [#allocation13], 128  }
  0x7d   :  { %302 = vsyncadd [#allocation13], 4294967168 }
  0x7e   :  { %125 = vsyncpa [#allocation3], 1 }
  0x7f   :  { %126 = vsyncpa [#allocation6], 1 }
  0x80   :  { %127 = vsyncpa [#allocation4], 1 }
  0x81   :  { %128 = vsyncpa [#allocation10], 1 }
  0x82   :  { %129 = vsyncpa [#allocation13], 1 }

</bundles_post_ra>
